<compile_context>
chip_gen: v7x
topology: tpu7x:2x2x1
jax: 0.10.0
libtpu: 0.0.40
codegen_flags: <defaults>
</compile_context>

<pallas_src>
import math
import functools

import jax
import jax.numpy as jnp
from jax import lax
from jax.experimental import pallas as pl
from jax.experimental.pallas import tpu as pltpu


def _round_up(x, m):
    return (x + m - 1) // m * m


# ----------------------- fused GraphTransformer kernel ----------------------

def _make_gt_kernel(n_edges, tile_e, n_tiles):
    """Builds the fused kernel: one grid step == one GTLayer.

    Layer 0 also runs the W_P input projection (+ W_pos); the last layer also
    runs inverW_P + graph_projector and writes the single output block.
    """
    need_mask = (n_tiles * tile_e != n_edges)

    def kernel(rows_ref, cols_ref,                          # scalar-prefetch (SMEM)
               x_ref, wp_w_ref, wp_b_ref, wpos_ref,         # layer-invariant inputs
               hsum_ref, hexp_ref,
               qw_ref, kw_ref, vw_ref, gamma_ref, beta_ref,  # per-layer (stacked)
               invw_ref, invb_ref, projw_ref, projb_ref,
               out_ref,
               emb_ref, num_ref, den_ref,                   # node-state scratch
               row_buf, col_buf, res_buf, expw_buf):        # edge-tile scratch
        layer = pl.program_id(0)

        @pl.when(layer == 0)
        def _init():
            # z = W_P(x) + W_pos ; nn.Dropout(0.1) is identity in eval mode.
            z = jnp.dot(x_ref[...].astype(jnp.bfloat16), wp_w_ref[...],
                        preferred_element_type=jnp.float32) + wp_b_ref[...]
            emb_ref[...] = z + wpos_ref[...]

        # Per-layer per-(node, head) accumulators (head value replicated on lanes).
        num_ref[...] = jnp.zeros_like(num_ref)
        den_ref[...] = jnp.zeros_like(den_ref)

        def edge_tile(tile, carry):
            base = tile * tile_e

            # --- gather embeds[rows], embeds[cols] for this edge tile ---
            def gather(e, c):
                g = base + e
                r = rows_ref[g]
                cc = cols_ref[g]
                row_buf[pl.ds(e, 1), :] = emb_ref[pl.ds(r, 1), :]
                col_buf[pl.ds(e, 1), :] = emb_ref[pl.ds(cc, 1), :]
                return c
            lax.fori_loop(0, tile_e, gather, 0)

            row_emb = row_buf[...].astype(jnp.bfloat16)
            col_emb = col_buf[...].astype(jnp.bfloat16)
            q = jnp.dot(row_emb, qw_ref[...], preferred_element_type=jnp.float32)
            k = jnp.dot(col_emb, kw_ref[...], preferred_element_type=jnp.float32)
            v = jnp.dot(col_emb, vw_ref[...], preferred_element_type=jnp.float32)

            # Compact per-head scores [tile_e, H_pad] (reference: einsum ehd,ehd->eh,
            # no 1/sqrt(d_head) scale, clamp to [-10, 10] before exp).
            att = jnp.dot(q * k, hsum_ref[...], preferred_element_type=jnp.float32)
            att = jnp.clip(att, -10.0, 10.0)
            exp_att = jnp.exp(att)                                    # [tile_e, H_pad]
            # Re-expand per-head weights across that head's lanes -> [tile_e, D].
            exp_rep = jnp.dot(exp_att, hexp_ref[...],
                              preferred_element_type=jnp.float32)
            res = exp_rep * v                                         # expAtt ⊗ v

            if need_mask:  # zero padded edges so they contribute nothing
                eidx = base + lax.broadcasted_iota(jnp.int32, (tile_e, 1), 0)
                valid = eidx < n_edges
                res = jnp.where(valid, res, 0.0)
                exp_rep = jnp.where(valid, exp_rep, 0.0)

            res_buf[...] = res
            expw_buf[...] = exp_rep

            # --- scatter-add (index_add_) into per-node accumulators ---
            def scatter(e, c):
                g = base + e
                r = rows_ref[g]
                num_ref[pl.ds(r, 1), :] = (num_ref[pl.ds(r, 1), :]
                                           + res_buf[pl.ds(e, 1), :])
                den_ref[pl.ds(r, 1), :] = (den_ref[pl.ds(r, 1), :]
                                           + expw_buf[pl.ds(e, 1), :])
                return c
            lax.fori_loop(0, tile_e, scatter, 0)
            return carry

        lax.fori_loop(0, n_tiles, edge_tile, 0)

        # sum_e expAtt*v / (sum_e expAtt + 1e-8) == index_add of per-edge
        # normalized attention (denominator constant per (node, head)); exact div.
        res_node = num_ref[...] / (den_ref[...] + 1e-8) + emb_ref[...]

        # LayerNorm(eps=1e-6)
        mean = jnp.mean(res_node, axis=-1, keepdims=True)
        var = jnp.mean((res_node - mean) ** 2, axis=-1, keepdims=True)
        normed = (res_node - mean) * lax.rsqrt(var + 1e-6)
        emb_ref[...] = normed * gamma_ref[...] + beta_ref[...]

        @pl.when(layer == pl.num_programs(0) - 1)
        def _finalize():
            ret = jnp.dot(emb_ref[...].astype(jnp.bfloat16), invw_ref[...],
                          preferred_element_type=jnp.float32) + invb_ref[...]
            out_ref[...] = jnp.dot(ret.astype(jnp.bfloat16), projw_ref[...],
                                   preferred_element_type=jnp.float32) + projb_ref[...]

    return kernel


def graph_transformer_project(params, node_x, edge_index, head):
    """GraphTransformer + graph_projector in one pallas_call (grid over layers)."""
    nvar, gnn_in = node_x.shape
    d_model = params["W_P_w"].shape[1]
    gnn_out = params["invW_P_w"].shape[1]
    proj_out = params["proj_w"].shape[1]
    n_layers = params["qw_s"].shape[0]
    n_edges = int(edge_index.shape[1])

    # VMEM-bounded edge tile (multiple of 8 sublanes); peak VMEM independent of E.
    tile_e = min(512, _round_up(max(n_edges, 1), 8))
    e_pad = _round_up(max(n_edges, 1), tile_e)
    n_tiles = e_pad // tile_e

    rows = jnp.zeros((e_pad,), jnp.int32).at[:n_edges].set(edge_index[0].astype(jnp.int32))
    cols = jnp.zeros((e_pad,), jnp.int32).at[:n_edges].set(edge_index[1].astype(jnp.int32))

    # Head reduce / expand matrices (head axis padded to >= 8; pad heads are inert).
    h_pad = max(8, head)
    dh = d_model // head
    head_of = jnp.arange(d_model) // dh
    head_sum = (head_of[:, None] == jnp.arange(h_pad)[None, :]).astype(jnp.float32)   # [D, Hp]
    head_expand = head_sum.T                                                          # [Hp, D]

    # bf16 MXU operands (no-op casts if params are already stored bf16).
    wp_w = params["W_P_w"].astype(jnp.bfloat16)
    qw_s = params["qw_s"].astype(jnp.bfloat16)
    kw_s = params["kw_s"].astype(jnp.bfloat16)
    vw_s = params["vw_s"].astype(jnp.bfloat16)
    invw = params["invW_P_w"].astype(jnp.bfloat16)
    projw = params["proj_w"].astype(jnp.bfloat16)

    def const2d(shape):
        # Layer-invariant operand: block index never changes -> stays VMEM resident.
        # TODO(synk): pipeline_mode=pl.Buffered(1) would halve their double-buffer
        # footprint; left at the default depth for lowering compatibility.
        return pl.BlockSpec(shape, lambda l, rows, cols: (0, 0))

    def per_layer(shape):
        # Stacked per-layer weights: leading (layer) dim squeezed, picked by grid idx.
        return pl.BlockSpec((None,) + shape, lambda l, rows, cols: (l, 0, 0))

    flops = (2 * nvar * gnn_in * d_model
             + n_layers * (6 * e_pad * d_model * d_model
                           + 4 * e_pad * d_model * h_pad
                           + 12 * nvar * d_model)
             + 2 * nvar * d_model * gnn_out + 2 * nvar * gnn_out * proj_out)
    transcendentals = n_layers * (e_pad * h_pad + nvar)
    bytes_accessed = (2 * (gnn_in * d_model + 3 * n_layers * d_model * d_model
                           + d_model * gnn_out + gnn_out * proj_out)
                      + 4 * (nvar * gnn_in + nvar * proj_out
                             + (2 + 2 * n_layers) * d_model + gnn_out + proj_out)
                      + 8 * e_pad)

    kernel = _make_gt_kernel(n_edges, tile_e, n_tiles)

    grid_spec = pltpu.PrefetchScalarGridSpec(
        num_scalar_prefetch=2,
        grid=(n_layers,),
        in_specs=[
            const2d((nvar, gnn_in)),            # node features
            const2d((gnn_in, d_model)),         # W_P_w (bf16)
            const2d((1, d_model)),              # W_P_b
            const2d((1, d_model)),              # W_pos
            const2d((d_model, h_pad)),          # head_sum
            const2d((h_pad, d_model)),          # head_expand
            per_layer((d_model, d_model)),      # qTrans (bf16)
            per_layer((d_model, d_model)),      # kTrans (bf16)
            per_layer((d_model, d_model)),      # vTrans (bf16)
            per_layer((1, d_model)),            # LayerNorm gamma
            per_layer((1, d_model)),            # LayerNorm beta
            const2d((d_model, gnn_out)),        # inverW_P_w (bf16)
            const2d((1, gnn_out)),              # inverW_P_b
            const2d((gnn_out, proj_out)),       # graph_projector w (bf16)
            const2d((1, proj_out)),             # graph_projector b
        ],
        out_specs=pl.BlockSpec((nvar, proj_out), lambda l, rows, cols: (0, 0)),
        scratch_shapes=[
            pltpu.VMEM((nvar, d_model), jnp.float32),    # embeds (carried across layers)
            pltpu.VMEM((nvar, d_model), jnp.float32),    # per-node numerator
            pltpu.VMEM((nvar, d_model), jnp.float32),    # per-node denominator
            pltpu.VMEM((tile_e, d_model), jnp.float32),  # gathered row embeds
            pltpu.VMEM((tile_e, d_model), jnp.float32),  # gathered col embeds
            pltpu.VMEM((tile_e, d_model), jnp.float32),  # expAtt * v
            pltpu.VMEM((tile_e, d_model), jnp.float32),  # expAtt (lane-replicated)
        ],
    )

    # TODO(synk): on v7x add a leading "parallel" grid axis (batch several graphs
    # per call) so both TensorCores are used; a single graph's layer chain is
    # inherently sequential.  At production configs pick d_model / num_token*
    # embed_dim as multiples of 128/256 for lane-dense MXU output and stores.
    return pl.pallas_call(
        kernel,
        out_shape=jax.ShapeDtypeStruct((nvar, proj_out), jnp.float32),
        grid_spec=grid_spec,
        compiler_params=pltpu.CompilerParams(
            dimension_semantics=("arbitrary",),          # layers carry state
            vmem_limit_bytes=32 * 1024 * 1024),
        cost_estimate=pl.CostEstimate(flops=int(flops),
                                      transcendentals=int(transcendentals),
                                      bytes_accessed=int(bytes_accessed)),
    )(rows, cols,
      node_x, wp_w, params["W_P_b"], params["W_pos"], head_sum, head_expand,
      qw_s, kw_s, vw_s, params["gamma_s"], params["beta_s"],
      invw, params["invW_P_b"], projw, params["proj_b"])


# ------------------ embed_tokens row gather + is_node scatter ----------------

def _tail_kernel(ids_ref, ridx_ref, mask_ref, tok_ref, node_ref, out_ref):
    """out[r] = node_emb[ridx[r]] if is_node[r] else embed_tokens[ids[r]].

    Both candidate rows arrive via data-dependent index_maps (one row per grid
    step, pipelined from HBM) — the vocab table is never VMEM-resident.
    """
    r = pl.program_id(0)
    use_node = mask_ref[r] != 0
    out_ref[...] = jnp.where(use_node, node_ref[...], tok_ref[...])


def fused_embed_scatter(input_ids, is_node, embed_tokens, node_embeddings):
    b, s = input_ids.shape
    bs = b * s
    vocab, embed_dim = embed_tokens.shape

    flat_ids = input_ids.reshape(bs).astype(jnp.int32)
    flat_mask = is_node.reshape(bs).astype(jnp.int32)
    # Row-major order of True positions (matches inputs_embeds[is_node] = node_emb).
    # TODO(synk): assumes sum(is_node) == node_embeddings.shape[0] as in the
    # PyTorch reference; a mismatch silently reuses node row 0.
    ridx = jnp.where(flat_mask != 0, jnp.cumsum(flat_mask) - 1, 0).astype(jnp.int32)

    # 3-D views so every block's trailing two dims equal the full array dims.
    tok3 = embed_tokens.reshape(vocab, 1, embed_dim)
    node3 = node_embeddings.reshape(-1, 1, embed_dim)

    out = pl.pallas_call(
        _tail_kernel,
        out_shape=jax.ShapeDtypeStruct((bs, 1, embed_dim), jnp.float32),
        grid_spec=pltpu.PrefetchScalarGridSpec(
            num_scalar_prefetch=3,
            grid=(bs,),
            in_specs=[
                pl.BlockSpec((1, 1, embed_dim),
                             lambda r, ids, ridx, m: (ids[r], 0, 0)),
                pl.BlockSpec((1, 1, embed_dim),
                             lambda r, ids, ridx, m: (ridx[r], 0, 0)),
            ],
            out_specs=pl.BlockSpec((1, 1, embed_dim),
                                   lambda r, ids, ridx, m: (r, 0, 0)),
        ),
        compiler_params=pltpu.CompilerParams(
            dimension_semantics=("parallel",)),          # independent rows
        cost_estimate=pl.CostEstimate(
            flops=bs * embed_dim,
            transcendentals=0,
            bytes_accessed=4 * (2 * bs * embed_dim + 3 * bs)),
    )(flat_ids, ridx, flat_mask, tok3, node3)
    return out.reshape(b, s, embed_dim)


# ------------------------------ forward pass --------------------------------

def graph_encoder_forward(params, input_ids, is_node, node_x, edge_index,
                          num_token, embed_dim, head):
    # --- GraphTransformer + graph_projector (one fused, layer-gridded kernel) ---
    node_embedding = graph_transformer_project(params, node_x, edge_index, head)
    node_embeddings = node_embedding.reshape(-1, embed_dim)   # [nvar*num_token, embed_dim]
    # --- embed_tokens row gather + boolean-mask scatter (one pipelined kernel) ---
    return fused_embed_scatter(input_ids, is_node, params["embed_tokens"],
                               node_embeddings)


# --------------------------------- driver -----------------------------------

if __name__ == "__main__":
    # config ("args")
    gnn_input = 16
    att_d_model = 32
    head = 4
    gnn_output = 32
    gt_layers = 2
    num_token = 2
    embed_dim = 32          # llama embed dim (small synthetic)
    vocab_size = 64
    batch, seq = 2, 8
    nvar, n_edges = 4, 8    # is_node selects nvar*num_token = 8 positions

    key = jax.random.PRNGKey(0)
    ks = jax.random.split(key, 20)

    def xavier(k, shape):
        bound = math.sqrt(6.0 / (shape[0] + shape[1]))
        return jax.random.uniform(k, shape, jnp.float32, -bound, bound)

    qw, kw, vw, gamma, beta = [], [], [], [], []
    for i in range(gt_layers):
        kk = jax.random.split(ks[8 + i], 3)
        qw.append(xavier(kk[0], (att_d_model, att_d_model)))
        kw.append(xavier(kk[1], (att_d_model, att_d_model)))
        vw.append(xavier(kk[2], (att_d_model, att_d_model)))
        gamma.append(jnp.ones((1, att_d_model), jnp.float32))   # LayerNorm weight = 1
        beta.append(jnp.zeros((1, att_d_model), jnp.float32))

    params = {
        # MXU weights stored bf16 (f32 accumulation in-kernel); biases/LN/W_pos f32.
        "W_P_w": jax.random.normal(ks[0], (gnn_input, att_d_model), jnp.float32).astype(jnp.bfloat16),
        "W_P_b": jax.random.uniform(ks[1], (1, att_d_model), jnp.float32, -0.1, 0.1),
        "W_pos": jax.random.uniform(ks[2], (1, att_d_model), jnp.float32, -0.02, 0.02),
        "invW_P_w": jax.random.normal(ks[3], (att_d_model, gnn_output), jnp.float32).astype(jnp.bfloat16),
        "invW_P_b": jax.random.uniform(ks[4], (1, gnn_output), jnp.float32, -0.1, 0.1),
        "proj_w": jax.random.normal(ks[5], (gnn_output, num_token * embed_dim), jnp.float32).astype(jnp.bfloat16),
        "proj_b": jax.random.uniform(ks[6], (1, num_token * embed_dim), jnp.float32, -0.1, 0.1),
        "embed_tokens": jax.random.normal(ks[7], (vocab_size, embed_dim), jnp.float32),
        # per-layer GTLayer params stacked on a leading layer axis
        "qw_s": jnp.stack(qw).astype(jnp.bfloat16),     # [L, D, D]
        "kw_s": jnp.stack(kw).astype(jnp.bfloat16),
        "vw_s": jnp.stack(vw).astype(jnp.bfloat16),
        "gamma_s": jnp.stack(gamma),                    # [L, 1, D]
        "beta_s": jnp.stack(beta),
    }

    # inputs
    input_ids = jax.random.randint(ks[12], (batch, seq), 0, vocab_size)
    is_node = jnp.zeros((batch, seq), jnp.bool_).at[:, :num_token * nvar // batch].set(True)
    node_x = 0.1 * jax.random.normal(ks[13], (nvar, gnn_input), jnp.float32)
    edge_index = jnp.stack([
        jax.random.randint(ks[14], (n_edges,), 0, nvar),
        jax.random.randint(ks[15], (n_edges,), 0, nvar),
    ], axis=0)

    fwd = jax.jit(functools.partial(graph_encoder_forward,
                                    num_token=num_token, embed_dim=embed_dim, head=head))
    out = fwd(params, input_ids, is_node, node_x, edge_index)
    jax.block_until_ready(out)
    assert out.shape == (batch, seq, embed_dim)
    print("KERNEL_OK")
</pallas_src>

<mosaic_0001>
module attributes {stable_mosaic.version = 11 : i64} {
  func.func @_tail_kernel(%arg0: i32, %arg1: memref<16xi32, #tpu.memory_space<smem>>, %arg2: memref<16xi32, #tpu.memory_space<smem>>, %arg3: memref<16xi32, #tpu.memory_space<smem>>, %arg4: memref<1x1x32xf32, #tpu.memory_space<vmem>>, %arg5: memref<1x1x32xf32, #tpu.memory_space<vmem>>, %arg6: memref<1x1x32xf32, #tpu.memory_space<vmem>>) attributes {dimension_semantics = [#tpu.dimension_semantics<parallel>], iteration_bounds = array<i64: 16>, scalar_prefetch = 3 : i64, scratch_operands = 0 : i64, tpu.core_type = #tpu.core_type<tc>, window_params = [{transform_indices = @transform_0, window_bounds = array<i64: 1, 1, 32>}, {transform_indices = @transform_1, window_bounds = array<i64: 1, 1, 32>}, {transform_indices = @transform_2, window_bounds = array<i64: 1, 1, 32>}]} {
    %0 = arith.index_cast %arg0 : i32 to index
    %1 = memref.load %arg3[%0] : memref<16xi32, #tpu.memory_space<smem>>
    %c0_i32 = arith.constant 0 : i32
    %2 = arith.cmpi ne, %1, %c0_i32 : i32
    %c0 = arith.constant 0 : index
    %c0_0 = arith.constant 0 : index
    %c0_1 = arith.constant 0 : index
    %3 = vector.load %arg5[%c0, %c0_0, %c0_1] : memref<1x1x32xf32, #tpu.memory_space<vmem>>, vector<1x1x32xf32>
    %c0_2 = arith.constant 0 : index
    %c0_3 = arith.constant 0 : index
    %c0_4 = arith.constant 0 : index
    %4 = vector.load %arg4[%c0_2, %c0_3, %c0_4] : memref<1x1x32xf32, #tpu.memory_space<vmem>>, vector<1x1x32xf32>
    %5 = arith.select %2, %3, %4 : vector<1x1x32xf32>
    %c0_5 = arith.constant 0 : index
    %c0_6 = arith.constant 0 : index
    %c0_7 = arith.constant 0 : index
    %6 = vector.load %arg6[%c0_5, %c0_6, %c0_7] : memref<1x1x32xf32, #tpu.memory_space<vmem>>, vector<1x1x32xf32>
    tpu.vector_store %arg6[%c0_5, %c0_6, %c0_7], %5 {strides = array<i32>} : memref<1x1x32xf32, #tpu.memory_space<vmem>>, vector<1x1x32xf32>,
    return
  }
  func.func @transform_0(%arg0: i32, %arg1: memref<16xi32, #tpu.memory_space<smem>>, %arg2: memref<16xi32, #tpu.memory_space<smem>>, %arg3: memref<16xi32, #tpu.memory_space<smem>>) -> (i32, i32, i32) {
    %0 = arith.index_cast %arg0 : i32 to index
    %1 = memref.load %arg1[%0] : memref<16xi32, #tpu.memory_space<smem>>
    %c0_i32 = arith.constant 0 : i32
    %c0_i32_0 = arith.constant 0 : i32
    %c0_i32_1 = arith.constant 0 : i32
    return %1, %c0_i32, %c0_i32_0 : i32, i32, i32
  }
  func.func @transform_1(%arg0: i32, %arg1: memref<16xi32, #tpu.memory_space<smem>>, %arg2: memref<16xi32, #tpu.memory_space<smem>>, %arg3: memref<16xi32, #tpu.memory_space<smem>>) -> (i32, i32, i32) {
    %0 = arith.index_cast %arg0 : i32 to index
    %1 = memref.load %arg2[%0] : memref<16xi32, #tpu.memory_space<smem>>
    %c0_i32 = arith.constant 0 : i32
    %c0_i32_0 = arith.constant 0 : i32
    %c0_i32_1 = arith.constant 0 : i32
    return %1, %c0_i32, %c0_i32_0 : i32, i32, i32
  }
  func.func @transform_2(%arg0: i32, %arg1: memref<16xi32, #tpu.memory_space<smem>>, %arg2: memref<16xi32, #tpu.memory_space<smem>>, %arg3: memref<16xi32, #tpu.memory_space<smem>>) -> (i32, i32, i32) {
    %c0_i32 = arith.constant 0 : i32
    %c0_i32_0 = arith.constant 0 : i32
    %c0_i32_1 = arith.constant 0 : i32
    return %arg0, %c0_i32, %c0_i32_0 : i32, i32, i32
  }
}

module attributes {stable_mosaic.version = 11 : i64} {
  func.func @kernel(%arg0: i32, %arg1: memref<8xi32, #tpu.memory_space<smem>>, %arg2: memref<8xi32, #tpu.memory_space<smem>>, %arg3: memref<4x16xf32, #tpu.memory_space<vmem>>, %arg4: memref<16x32xbf16, #tpu.memory_space<vmem>>, %arg5: memref<1x32xf32, #tpu.memory_space<vmem>>, %arg6: memref<1x32xf32, #tpu.memory_space<vmem>>, %arg7: memref<32x8xf32, #tpu.memory_space<vmem>>, %arg8: memref<8x32xf32, #tpu.memory_space<vmem>>, %arg9: memref<1x32x32xbf16, #tpu.memory_space<vmem>>, %arg10: memref<1x32x32xbf16, #tpu.memory_space<vmem>>, %arg11: memref<1x32x32xbf16, #tpu.memory_space<vmem>>, %arg12: memref<1x1x32xf32, #tpu.memory_space<vmem>>, %arg13: memref<1x1x32xf32, #tpu.memory_space<vmem>>, %arg14: memref<32x32xbf16, #tpu.memory_space<vmem>>, %arg15: memref<1x32xf32, #tpu.memory_space<vmem>>, %arg16: memref<32x64xbf16, #tpu.memory_space<vmem>>, %arg17: memref<1x64xf32, #tpu.memory_space<vmem>>, %arg18: memref<4x64xf32, #tpu.memory_space<vmem>>, %arg19: memref<4x32xf32, #tpu.memory_space<vmem>>, %arg20: memref<4x32xf32, #tpu.memory_space<vmem>>, %arg21: memref<4x32xf32, #tpu.memory_space<vmem>>, %arg22: memref<8x32xf32, #tpu.memory_space<vmem>>, %arg23: memref<8x32xf32, #tpu.memory_space<vmem>>, %arg24: memref<8x32xf32, #tpu.memory_space<vmem>>, %arg25: memref<8x32xf32, #tpu.memory_space<vmem>>) attributes {dimension_semantics = [#tpu.dimension_semantics<arbitrary>], iteration_bounds = array<i64: 2>, scalar_prefetch = 2 : i64, scratch_operands = 7 : i64, tpu.core_type = #tpu.core_type<tc>, window_params = [{pipeline_mode = #tpu.pipeline_mode<synchronous>, transform_indices = @transform_0, window_bounds = array<i64: 4, 16>}, {pipeline_mode = #tpu.pipeline_mode<synchronous>, transform_indices = @transform_1, window_bounds = array<i64: 16, 32>}, {pipeline_mode = #tpu.pipeline_mode<synchronous>, transform_indices = @transform_2, window_bounds = array<i64: 1, 32>}, {pipeline_mode = #tpu.pipeline_mode<synchronous>, transform_indices = @transform_3, window_bounds = array<i64: 1, 32>}, {pipeline_mode = #tpu.pipeline_mode<synchronous>, transform_indices = @transform_4, window_bounds = array<i64: 32, 8>}, {pipeline_mode = #tpu.pipeline_mode<synchronous>, transform_indices = @transform_5, window_bounds = array<i64: 8, 32>}, {transform_indices = @transform_6, window_bounds = array<i64: 1, 32, 32>}, {transform_indices = @transform_7, window_bounds = array<i64: 1, 32, 32>}, {transform_indices = @transform_8, window_bounds = array<i64: 1, 32, 32>}, {transform_indices = @transform_9, window_bounds = array<i64: 1, 1, 32>}, {transform_indices = @transform_10, window_bounds = array<i64: 1, 1, 32>}, {pipeline_mode = #tpu.pipeline_mode<synchronous>, transform_indices = @transform_11, window_bounds = array<i64: 32, 32>}, {pipeline_mode = #tpu.pipeline_mode<synchronous>, transform_indices = @transform_12, window_bounds = array<i64: 1, 32>}, {pipeline_mode = #tpu.pipeline_mode<synchronous>, transform_indices = @transform_13, window_bounds = array<i64: 32, 64>}, {pipeline_mode = #tpu.pipeline_mode<synchronous>, transform_indices = @transform_14, window_bounds = array<i64: 1, 64>}, {pipeline_mode = #tpu.pipeline_mode<synchronous>, transform_indices = @transform_15, window_bounds = array<i64: 4, 64>}]} {
    %c0_i32 = arith.constant 0 : i32
    %0 = arith.cmpi eq, %arg0, %c0_i32 : i32
    %1 = arith.extui %0 : i1 to i32
    %c0_i32_0 = arith.constant 0 : i32
    %2 = arith.cmpi ne, %1, %c0_i32_0 : i32
    scf.if %2 {
      %c0_64 = arith.constant 0 : index
      %c0_65 = arith.constant 0 : index
      %73 = vector.load %arg3[%c0_64, %c0_65] : memref<4x16xf32, #tpu.memory_space<vmem>>, vector<4x16xf32>
      %74 = arith.truncf %73 : vector<4x16xf32> to vector<4x16xbf16>
      %c0_66 = arith.constant 0 : index
      %c0_67 = arith.constant 0 : index
      %75 = vector.load %arg4[%c0_66, %c0_67] : memref<16x32xbf16, #tpu.memory_space<vmem>>, vector<16x32xbf16>
      %cst_68 = arith.constant dense<0.000000e+00> : vector<4x32xf32>
      %76 = tpu.matmul %74, %75, %cst_68 {dimension_numbers = #tpu.dot_dimension_numbers<[1], [0], [0], [1], [0, 0, 1, 1], [], []>} : vector<4x16xbf16>, vector<16x32xbf16>, vector<4x32xf32> -> vector<4x32xf32>
      %c0_69 = arith.constant 0 : index
      %c0_70 = arith.constant 0 : index
      %77 = vector.load %arg5[%c0_69, %c0_70] : memref<1x32xf32, #tpu.memory_space<vmem>>, vector<1x32xf32>
      %78 = vector.broadcast %77 : vector<1x32xf32> to vector<4x32xf32>
      %79 = arith.addf %76, %78 : vector<4x32xf32>
      %c0_71 = arith.constant 0 : index
      %c0_72 = arith.constant 0 : index
      %80 = vector.load %arg6[%c0_71, %c0_72] : memref<1x32xf32, #tpu.memory_space<vmem>>, vector<1x32xf32>
      %81 = vector.broadcast %80 : vector<1x32xf32> to vector<4x32xf32>
      %82 = arith.addf %79, %81 : vector<4x32xf32>
      %c0_73 = arith.constant 0 : index
      %c0_74 = arith.constant 0 : index
      %83 = vector.load %arg19[%c0_73, %c0_74] : memref<4x32xf32, #tpu.memory_space<vmem>>, vector<4x32xf32>
      tpu.vector_store %arg19[%c0_73, %c0_74], %82 {strides = array<i32>} : memref<4x32xf32, #tpu.memory_space<vmem>>, vector<4x32xf32>,
    } else {
    }
    %cst = arith.constant 0.000000e+00 : f32
    %3 = vector.broadcast %cst : f32 to vector<4x32xf32>
    %c0 = arith.constant 0 : index
    %c0_1 = arith.constant 0 : index
    %4 = vector.load %arg20[%c0, %c0_1] : memref<4x32xf32, #tpu.memory_space<vmem>>, vector<4x32xf32>
    tpu.vector_store %arg20[%c0, %c0_1], %3 {strides = array<i32>} : memref<4x32xf32, #tpu.memory_space<vmem>>, vector<4x32xf32>,
    %cst_2 = arith.constant 0.000000e+00 : f32
    %5 = vector.broadcast %cst_2 : f32 to vector<4x32xf32>
    %c0_3 = arith.constant 0 : index
    %c0_4 = arith.constant 0 : index
    %6 = vector.load %arg21[%c0_3, %c0_4] : memref<4x32xf32, #tpu.memory_space<vmem>>, vector<4x32xf32>
    tpu.vector_store %arg21[%c0_3, %c0_4], %5 {strides = array<i32>} : memref<4x32xf32, #tpu.memory_space<vmem>>, vector<4x32xf32>,
    %c0_i32_5 = arith.constant 0 : i32
    %c8_i32 = arith.constant 8 : i32
    %7 = arith.muli %c0_i32_5, %c8_i32 : i32
    %c0_i32_6 = arith.constant 0 : i32
    %c8_i32_7 = arith.constant 8 : i32
    %8 = arith.addi %c0_i32_6, %c8_i32_7 : i32
    %c1_i32 = arith.constant 1 : i32
    scf.for %arg26 = %c0_i32_6 to %8 step %c1_i32  : i32 {
      %73 = arith.addi %7, %arg26 : i32
      %74 = arith.index_cast %73 : i32 to index
      %75 = memref.load %arg1[%74] : memref<8xi32, #tpu.memory_space<smem>>
      %76 = arith.index_cast %73 : i32 to index
      %77 = memref.load %arg2[%76] : memref<8xi32, #tpu.memory_space<smem>>
      %78 = arith.index_cast %75 : i32 to index
      %c0_64 = arith.constant 0 : index
      %79 = vector.load %arg19[%78, %c0_64] : memref<4x32xf32, #tpu.memory_space<vmem>>, vector<1x32xf32>
      %80 = arith.index_cast %arg26 : i32 to index
      %c0_65 = arith.constant 0 : index
      %81 = vector.load %arg22[%80, %c0_65] : memref<8x32xf32, #tpu.memory_space<vmem>>, vector<1x32xf32>
      tpu.vector_store %arg22[%80, %c0_65], %79 {strides = array<i32>} : memref<8x32xf32, #tpu.memory_space<vmem>>, vector<1x32xf32>,
      %82 = arith.index_cast %77 : i32 to index
      %c0_66 = arith.constant 0 : index
      %83 = vector.load %arg19[%82, %c0_66] : memref<4x32xf32, #tpu.memory_space<vmem>>, vector<1x32xf32>
      %84 = arith.index_cast %arg26 : i32 to index
      %c0_67 = arith.constant 0 : index
      %85 = vector.load %arg23[%84, %c0_67] : memref<8x32xf32, #tpu.memory_space<vmem>>, vector<1x32xf32>
      tpu.vector_store %arg23[%84, %c0_67], %83 {strides = array<i32>} : memref<8x32xf32, #tpu.memory_space<vmem>>, vector<1x32xf32>,
    }
    %c8_i32_8 = arith.constant 8 : i32
    %c0_9 = arith.constant 0 : index
    %c0_10 = arith.constant 0 : index
    %9 = vector.load %arg22[%c0_9, %c0_10] : memref<8x32xf32, #tpu.memory_space<vmem>>, vector<8x32xf32>
    %10 = arith.truncf %9 : vector<8x32xf32> to vector<8x32xbf16>
    %c0_11 = arith.constant 0 : index
    %c0_12 = arith.constant 0 : index
    %11 = vector.load %arg23[%c0_11, %c0_12] : memref<8x32xf32, #tpu.memory_space<vmem>>, vector<8x32xf32>
    %12 = arith.truncf %11 : vector<8x32xf32> to vector<8x32xbf16>
    %c0_13 = arith.constant 0 : index
    %c0_14 = arith.constant 0 : index
    %c0_15 = arith.constant 0 : index
    %13 = vector.load %arg9[%c0_13, %c0_14, %c0_15] : memref<1x32x32xbf16, #tpu.memory_space<vmem>>, vector<1x32x32xbf16>
    %14 = vector.shape_cast %13 : vector<1x32x32xbf16> to vector<32x32xbf16>
    %cst_16 = arith.constant dense<0.000000e+00> : vector<8x32xf32>
    %15 = tpu.matmul %10, %14, %cst_16 {dimension_numbers = #tpu.dot_dimension_numbers<[1], [0], [0], [1], [0, 0, 1, 1], [], []>} : vector<8x32xbf16>, vector<32x32xbf16>, vector<8x32xf32> -> vector<8x32xf32>
    %c0_17 = arith.constant 0 : index
    %c0_18 = arith.constant 0 : index
    %c0_19 = arith.constant 0 : index
    %16 = vector.load %arg10[%c0_17, %c0_18, %c0_19] : memref<1x32x32xbf16, #tpu.memory_space<vmem>>, vector<1x32x32xbf16>
    %17 = vector.shape_cast %16 : vector<1x32x32xbf16> to vector<32x32xbf16>
    %cst_20 = arith.constant dense<0.000000e+00> : vector<8x32xf32>
    %18 = tpu.matmul %12, %17, %cst_20 {dimension_numbers = #tpu.dot_dimension_numbers<[1], [0], [0], [1], [0, 0, 1, 1], [], []>} : vector<8x32xbf16>, vector<32x32xbf16>, vector<8x32xf32> -> vector<8x32xf32>
    %c0_21 = arith.constant 0 : index
    %c0_22 = arith.constant 0 : index
    %c0_23 = arith.constant 0 : index
    %19 = vector.load %arg11[%c0_21, %c0_22, %c0_23] : memref<1x32x32xbf16, #tpu.memory_space<vmem>>, vector<1x32x32xbf16>
    %20 = vector.shape_cast %19 : vector<1x32x32xbf16> to vector<32x32xbf16>
    %cst_24 = arith.constant dense<0.000000e+00> : vector<8x32xf32>
    %21 = tpu.matmul %12, %20, %cst_24 {dimension_numbers = #tpu.dot_dimension_numbers<[1], [0], [0], [1], [0, 0, 1, 1], [], []>} : vector<8x32xbf16>, vector<32x32xbf16>, vector<8x32xf32> -> vector<8x32xf32>
    %22 = arith.mulf %15, %18 : vector<8x32xf32>
    %c0_25 = arith.constant 0 : index
    %c0_26 = arith.constant 0 : index
    %23 = vector.load %arg7[%c0_25, %c0_26] : memref<32x8xf32, #tpu.memory_space<vmem>>, vector<32x8xf32>
    %cst_27 = arith.constant dense<0.000000e+00> : vector<8x8xf32>
    %24 = tpu.matmul %22, %23, %cst_27 {dimension_numbers = #tpu.dot_dimension_numbers<[1], [0], [0], [1], [0, 0, 1, 1], [], []>} : vector<8x32xf32>, vector<32x8xf32>, vector<8x8xf32> -> vector<8x8xf32>
    %cst_28 = arith.constant -1.000000e+01 : f32
    %cst_29 = arith.constant 1.000000e+01 : f32
    %25 = vector.broadcast %cst_28 : f32 to vector<8x8xf32>
    %26 = arith.maximumf %25, %24 : vector<8x8xf32>
    %27 = vector.broadcast %cst_29 : f32 to vector<8x8xf32>
    %28 = arith.minimumf %27, %26 : vector<8x8xf32>
    %29 = math.exp %28 : vector<8x8xf32>
    %c0_30 = arith.constant 0 : index
    %c0_31 = arith.constant 0 : index
    %30 = vector.load %arg8[%c0_30, %c0_31] : memref<8x32xf32, #tpu.memory_space<vmem>>, vector<8x32xf32>
    %cst_32 = arith.constant dense<0.000000e+00> : vector<8x32xf32>
    %31 = tpu.matmul %29, %30, %cst_32 {dimension_numbers = #tpu.dot_dimension_numbers<[1], [0], [0], [1], [0, 0, 1, 1], [], []>} : vector<8x8xf32>, vector<8x32xf32>, vector<8x32xf32> -> vector<8x32xf32>
    %32 = arith.mulf %31, %21 : vector<8x32xf32>
    %c0_33 = arith.constant 0 : index
    %c0_34 = arith.constant 0 : index
    %33 = vector.load %arg24[%c0_33, %c0_34] : memref<8x32xf32, #tpu.memory_space<vmem>>, vector<8x32xf32>
    tpu.vector_store %arg24[%c0_33, %c0_34], %32 {strides = array<i32>} : memref<8x32xf32, #tpu.memory_space<vmem>>, vector<8x32xf32>,
    %c0_35 = arith.constant 0 : index
    %c0_36 = arith.constant 0 : index
    %34 = vector.load %arg25[%c0_35, %c0_36] : memref<8x32xf32, #tpu.memory_space<vmem>>, vector<8x32xf32>
    tpu.vector_store %arg25[%c0_35, %c0_36], %31 {strides = array<i32>} : memref<8x32xf32, #tpu.memory_space<vmem>>, vector<8x32xf32>,
    %c0_i32_37 = arith.constant 0 : i32
    %c8_i32_38 = arith.constant 8 : i32
    %35 = arith.addi %c0_i32_37, %c8_i32_38 : i32
    %c1_i32_39 = arith.constant 1 : i32
    scf.for %arg26 = %c0_i32_37 to %35 step %c1_i32_39  : i32 {
      %73 = arith.addi %7, %arg26 : i32
      %74 = arith.index_cast %73 : i32 to index
      %75 = memref.load %arg1[%74] : memref<8xi32, #tpu.memory_space<smem>>
      %76 = arith.index_cast %75 : i32 to index
      %c0_64 = arith.constant 0 : index
      %77 = vector.load %arg20[%76, %c0_64] : memref<4x32xf32, #tpu.memory_space<vmem>>, vector<1x32xf32>
      %78 = arith.index_cast %arg26 : i32 to index
      %c0_65 = arith.constant 0 : index
      %79 = vector.load %arg24[%78, %c0_65] : memref<8x32xf32, #tpu.memory_space<vmem>>, vector<1x32xf32>
      %80 = arith.addf %77, %79 : vector<1x32xf32>
      %81 = arith.index_cast %75 : i32 to index
      %c0_66 = arith.constant 0 : index
      %82 = vector.load %arg20[%81, %c0_66] : memref<4x32xf32, #tpu.memory_space<vmem>>, vector<1x32xf32>
      tpu.vector_store %arg20[%81, %c0_66], %80 {strides = array<i32>} : memref<4x32xf32, #tpu.memory_space<vmem>>, vector<1x32xf32>,
      %83 = arith.index_cast %75 : i32 to index
      %c0_67 = arith.constant 0 : index
      %84 = vector.load %arg21[%83, %c0_67] : memref<4x32xf32, #tpu.memory_space<vmem>>, vector<1x32xf32>
      %85 = arith.index_cast %arg26 : i32 to index
      %c0_68 = arith.constant 0 : index
      %86 = vector.load %arg25[%85, %c0_68] : memref<8x32xf32, #tpu.memory_space<vmem>>, vector<1x32xf32>
      %87 = arith.addf %84, %86 : vector<1x32xf32>
      %88 = arith.index_cast %75 : i32 to index
      %c0_69 = arith.constant 0 : index
      %89 = vector.load %arg21[%88, %c0_69] : memref<4x32xf32, #tpu.memory_space<vmem>>, vector<1x32xf32>
      tpu.vector_store %arg21[%88, %c0_69], %87 {strides = array<i32>} : memref<4x32xf32, #tpu.memory_space<vmem>>, vector<1x32xf32>,
    }
    %c8_i32_40 = arith.constant 8 : i32
    %c1_i32_41 = arith.constant 1 : i32
    %c0_42 = arith.constant 0 : index
    %c0_43 = arith.constant 0 : index
    %36 = vector.load %arg20[%c0_42, %c0_43] : memref<4x32xf32, #tpu.memory_space<vmem>>, vector<4x32xf32>
    %c0_44 = arith.constant 0 : index
    %c0_45 = arith.constant 0 : index
    %37 = vector.load %arg21[%c0_44, %c0_45] : memref<4x32xf32, #tpu.memory_space<vmem>>, vector<4x32xf32>
    %cst_46 = arith.constant 9.99999993E-9 : f32
    %38 = vector.broadcast %cst_46 : f32 to vector<4x32xf32>
    %39 = arith.addf %37, %38 : vector<4x32xf32>
    %40 = arith.divf %36, %39 : vector<4x32xf32>
    %c0_47 = arith.constant 0 : index
    %c0_48 = arith.constant 0 : index
    %41 = vector.load %arg19[%c0_47, %c0_48] : memref<4x32xf32, #tpu.memory_space<vmem>>, vector<4x32xf32>
    %42 = arith.addf %40, %41 : vector<4x32xf32>
    %cst_49 = arith.constant dense<0.000000e+00> : vector<4xf32>
    %43 = vector.multi_reduction <add>, %42, %cst_49 [1] : vector<4x32xf32> to vector<4xf32>
    %44 = vector.shape_cast %43 : vector<4xf32> to vector<4x1xf32>
    %cst_50 = arith.constant 3.200000e+01 : f32
    %45 = vector.broadcast %cst_50 : f32 to vector<4x1xf32>
    %46 = arith.divf %44, %45 : vector<4x1xf32>
    %47 = vector.broadcast %46 : vector<4x1xf32> to vector<4x32xf32>
    %48 = arith.subf %42, %47 : vector<4x32xf32>
    %49 = arith.mulf %48, %48 : vector<4x32xf32>
    %cst_51 = arith.constant dense<0.000000e+00> : vector<4xf32>
    %50 = vector.multi_reduction <add>, %49, %cst_51 [1] : vector<4x32xf32> to vector<4xf32>
    %51 = vector.shape_cast %50 : vector<4xf32> to vector<4x1xf32>
    %cst_52 = arith.constant 3.200000e+01 : f32
    %52 = vector.broadcast %cst_52 : f32 to vector<4x1xf32>
    %53 = arith.divf %51, %52 : vector<4x1xf32>
    %54 = vector.broadcast %46 : vector<4x1xf32> to vector<4x32xf32>
    %55 = arith.subf %42, %54 : vector<4x32xf32>
    %cst_53 = arith.constant 9.99999997E-7 : f32
    %56 = vector.broadcast %cst_53 : f32 to vector<4x1xf32>
    %57 = arith.addf %53, %56 : vector<4x1xf32>
    %58 = math.rsqrt %57 : vector<4x1xf32>
    %59 = vector.broadcast %58 : vector<4x1xf32> to vector<4x32xf32>
    %60 = arith.mulf %55, %59 : vector<4x32xf32>
    %c0_54 = arith.constant 0 : index
    %c0_55 = arith.constant 0 : index
    %c0_56 = arith.constant 0 : index
    %61 = vector.load %arg12[%c0_54, %c0_55, %c0_56] : memref<1x1x32xf32, #tpu.memory_space<vmem>>, vector<1x1x32xf32>
    %62 = vector.shape_cast %61 : vector<1x1x32xf32> to vector<1x32xf32>
    %63 = vector.broadcast %62 : vector<1x32xf32> to vector<4x32xf32>
    %64 = arith.mulf %60, %63 : vector<4x32xf32>
    %c0_57 = arith.constant 0 : index
    %c0_58 = arith.constant 0 : index
    %c0_59 = arith.constant 0 : index
    %65 = vector.load %arg13[%c0_57, %c0_58, %c0_59] : memref<1x1x32xf32, #tpu.memory_space<vmem>>, vector<1x1x32xf32>
    %66 = vector.shape_cast %65 : vector<1x1x32xf32> to vector<1x32xf32>
    %67 = vector.broadcast %66 : vector<1x32xf32> to vector<4x32xf32>
    %68 = arith.addf %64, %67 : vector<4x32xf32>
    %c0_60 = arith.constant 0 : index
    %c0_61 = arith.constant 0 : index
    %69 = vector.load %arg19[%c0_60, %c0_61] : memref<4x32xf32, #tpu.memory_space<vmem>>, vector<4x32xf32>
    tpu.vector_store %arg19[%c0_60, %c0_61], %68 {strides = array<i32>} : memref<4x32xf32, #tpu.memory_space<vmem>>, vector<4x32xf32>,
    %c1_i32_62 = arith.constant 1 : i32
    %70 = arith.cmpi eq, %arg0, %c1_i32_62 : i32
    %71 = arith.extui %70 : i1 to i32
    %c0_i32_63 = arith.constant 0 : i32
    %72 = arith.cmpi ne, %71, %c0_i32_63 : i32
    scf.if %72 {
      %c0_64 = arith.constant 0 : index
      %c0_65 = arith.constant 0 : index
      %73 = vector.load %arg19[%c0_64, %c0_65] : memref<4x32xf32, #tpu.memory_space<vmem>>, vector<4x32xf32>
      %74 = arith.truncf %73 : vector<4x32xf32> to vector<4x32xbf16>
      %c0_66 = arith.constant 0 : index
      %c0_67 = arith.constant 0 : index
      %75 = vector.load %arg14[%c0_66, %c0_67] : memref<32x32xbf16, #tpu.memory_space<vmem>>, vector<32x32xbf16>
      %cst_68 = arith.constant dense<0.000000e+00> : vector<4x32xf32>
      %76 = tpu.matmul %74, %75, %cst_68 {dimension_numbers = #tpu.dot_dimension_numbers<[1], [0], [0], [1], [0, 0, 1, 1], [], []>} : vector<4x32xbf16>, vector<32x32xbf16>, vector<4x32xf32> -> vector<4x32xf32>
      %c0_69 = arith.constant 0 : index
      %c0_70 = arith.constant 0 : index
      %77 = vector.load %arg15[%c0_69, %c0_70] : memref<1x32xf32, #tpu.memory_space<vmem>>, vector<1x32xf32>
      %78 = vector.broadcast %77 : vector<1x32xf32> to vector<4x32xf32>
      %79 = arith.addf %76, %78 : vector<4x32xf32>
      %80 = arith.truncf %79 : vector<4x32xf32> to vector<4x32xbf16>
      %c0_71 = arith.constant 0 : index
      %c0_72 = arith.constant 0 : index
      %81 = vector.load %arg16[%c0_71, %c0_72] : memref<32x64xbf16, #tpu.memory_space<vmem>>, vector<32x64xbf16>
      %cst_73 = arith.constant dense<0.000000e+00> : vector<4x64xf32>
      %82 = tpu.matmul %80, %81, %cst_73 {dimension_numbers = #tpu.dot_dimension_numbers<[1], [0], [0], [1], [0, 0, 1, 1], [], []>} : vector<4x32xbf16>, vector<32x64xbf16>, vector<4x64xf32> -> vector<4x64xf32>
      %c0_74 = arith.constant 0 : index
      %c0_75 = arith.constant 0 : index
      %83 = vector.load %arg17[%c0_74, %c0_75] : memref<1x64xf32, #tpu.memory_space<vmem>>, vector<1x64xf32>
      %84 = vector.broadcast %83 : vector<1x64xf32> to vector<4x64xf32>
      %85 = arith.addf %82, %84 : vector<4x64xf32>
      %c0_76 = arith.constant 0 : index
      %c0_77 = arith.constant 0 : index
      %86 = vector.load %arg18[%c0_76, %c0_77] : memref<4x64xf32, #tpu.memory_space<vmem>>, vector<4x64xf32>
      tpu.vector_store %arg18[%c0_76, %c0_77], %85 {strides = array<i32>} : memref<4x64xf32, #tpu.memory_space<vmem>>, vector<4x64xf32>,
    } else {
    }
    return
  }
  func.func @transform_0(%arg0: i32, %arg1: memref<8xi32, #tpu.memory_space<smem>>, %arg2: memref<8xi32, #tpu.memory_space<smem>>) -> (i32, i32) {
    %c0_i32 = arith.constant 0 : i32
    %c0_i32_0 = arith.constant 0 : i32
    %c0_i32_1 = arith.constant 0 : i32
    return %c0_i32, %c0_i32_0 : i32, i32
  }
  func.func @transform_1(%arg0: i32, %arg1: memref<8xi32, #tpu.memory_space<smem>>, %arg2: memref<8xi32, #tpu.memory_space<smem>>) -> (i32, i32) {
    %c0_i32 = arith.constant 0 : i32
    %c0_i32_0 = arith.constant 0 : i32
    %c0_i32_1 = arith.constant 0 : i32
    return %c0_i32, %c0_i32_0 : i32, i32
  }
  func.func @transform_2(%arg0: i32, %arg1: memref<8xi32, #tpu.memory_space<smem>>, %arg2: memref<8xi32, #tpu.memory_space<smem>>) -> (i32, i32) {
    %c0_i32 = arith.constant 0 : i32
    %c0_i32_0 = arith.constant 0 : i32
    %c0_i32_1 = arith.constant 0 : i32
    return %c0_i32, %c0_i32_0 : i32, i32
  }
  func.func @transform_3(%arg0: i32, %arg1: memref<8xi32, #tpu.memory_space<smem>>, %arg2: memref<8xi32, #tpu.memory_space<smem>>) -> (i32, i32) {
    %c0_i32 = arith.constant 0 : i32
    %c0_i32_0 = arith.constant 0 : i32
    %c0_i32_1 = arith.constant 0 : i32
    return %c0_i32, %c0_i32_0 : i32, i32
  }
  func.func @transform_4(%arg0: i32, %arg1: memref<8xi32, #tpu.memory_space<smem>>, %arg2: memref<8xi32, #tpu.memory_space<smem>>) -> (i32, i32) {
    %c0_i32 = arith.constant 0 : i32
    %c0_i32_0 = arith.constant 0 : i32
    %c0_i32_1 = arith.constant 0 : i32
    return %c0_i32, %c0_i32_0 : i32, i32
  }
  func.func @transform_5(%arg0: i32, %arg1: memref<8xi32, #tpu.memory_space<smem>>, %arg2: memref<8xi32, #tpu.memory_space<smem>>) -> (i32, i32) {
    %c0_i32 = arith.constant 0 : i32
    %c0_i32_0 = arith.constant 0 : i32
    %c0_i32_1 = arith.constant 0 : i32
    return %c0_i32, %c0_i32_0 : i32, i32
  }
  func.func @transform_6(%arg0: i32, %arg1: memref<8xi32, #tpu.memory_space<smem>>, %arg2: memref<8xi32, #tpu.memory_space<smem>>) -> (i32, i32, i32) {
    %c0_i32 = arith.constant 0 : i32
    %c0_i32_0 = arith.constant 0 : i32
    %c0_i32_1 = arith.constant 0 : i32
    return %arg0, %c0_i32, %c0_i32_0 : i32, i32, i32
  }
  func.func @transform_7(%arg0: i32, %arg1: memref<8xi32, #tpu.memory_space<smem>>, %arg2: memref<8xi32, #tpu.memory_space<smem>>) -> (i32, i32, i32) {
    %c0_i32 = arith.constant 0 : i32
    %c0_i32_0 = arith.constant 0 : i32
    %c0_i32_1 = arith.constant 0 : i32
    return %arg0, %c0_i32, %c0_i32_0 : i32, i32, i32
  }
  func.func @transform_8(%arg0: i32, %arg1: memref<8xi32, #tpu.memory_space<smem>>, %arg2: memref<8xi32, #tpu.memory_space<smem>>) -> (i32, i32, i32) {
    %c0_i32 = arith.constant 0 : i32
    %c0_i32_0 = arith.constant 0 : i32
    %c0_i32_1 = arith.constant 0 : i32
    return %arg0, %c0_i32, %c0_i32_0 : i32, i32, i32
  }
  func.func @transform_9(%arg0: i32, %arg1: memref<8xi32, #tpu.memory_space<smem>>, %arg2: memref<8xi32, #tpu.memory_space<smem>>) -> (i32, i32, i32) {
    %c0_i32 = arith.constant 0 : i32
    %c0_i32_0 = arith.constant 0 : i32
    %c0_i32_1 = arith.constant 0 : i32
    return %arg0, %c0_i32, %c0_i32_0 : i32, i32, i32
  }
  func.func @transform_10(%arg0: i32, %arg1: memref<8xi32, #tpu.memory_space<smem>>, %arg2: memref<8xi32, #tpu.memory_space<smem>>) -> (i32, i32, i32) {
    %c0_i32 = arith.constant 0 : i32
    %c0_i32_0 = arith.constant 0 : i32
    %c0_i32_1 = arith.constant 0 : i32
    return %arg0, %c0_i32, %c0_i32_0 : i32, i32, i32
  }
  func.func @transform_11(%arg0: i32, %arg1: memref<8xi32, #tpu.memory_space<smem>>, %arg2: memref<8xi32, #tpu.memory_space<smem>>) -> (i32, i32) {
    %c0_i32 = arith.constant 0 : i32
    %c0_i32_0 = arith.constant 0 : i32
    %c0_i32_1 = arith.constant 0 : i32
    return %c0_i32, %c0_i32_0 : i32, i32
  }
  func.func @transform_12(%arg0: i32, %arg1: memref<8xi32, #tpu.memory_space<smem>>, %arg2: memref<8xi32, #tpu.memory_space<smem>>) -> (i32, i32) {
    %c0_i32 = arith.constant 0 : i32
    %c0_i32_0 = arith.constant 0 : i32
    %c0_i32_1 = arith.constant 0 : i32
    return %c0_i32, %c0_i32_0 : i32, i32
  }
  func.func @transform_13(%arg0: i32, %arg1: memref<8xi32, #tpu.memory_space<smem>>, %arg2: memref<8xi32, #tpu.memory_space<smem>>) -> (i32, i32) {
    %c0_i32 = arith.constant 0 : i32
    %c0_i32_0 = arith.constant 0 : i32
    %c0_i32_1 = arith.constant 0 : i32
    return %c0_i32, %c0_i32_0 : i32, i32
  }
  func.func @transform_14(%arg0: i32, %arg1: memref<8xi32, #tpu.memory_space<smem>>, %arg2: memref<8xi32, #tpu.memory_space<smem>>) -> (i32, i32) {
    %c0_i32 = arith.constant 0 : i32
    %c0_i32_0 = arith.constant 0 : i32
    %c0_i32_1 = arith.constant 0 : i32
    return %c0_i32, %c0_i32_0 : i32, i32
  }
  func.func @transform_15(%arg0: i32, %arg1: memref<8xi32, #tpu.memory_space<smem>>, %arg2: memref<8xi32, #tpu.memory_space<smem>>) -> (i32, i32) {
    %c0_i32 = arith.constant 0 : i32
    %c0_i32_0 = arith.constant 0 : i32
    %c0_i32_1 = arith.constant 0 : i32
    return %c0_i32, %c0_i32_0 : i32, i32
  }
}

</mosaic_0001>

<bundles_post_ra>
// kernel: graph_encoder_forward.3
= control target key start
LH: loop header
LB: loop body
LE: loop exit
PB: predicated region body
PF: predicated region fallthrough
CT: control target
= control target key end

     0   :  { %s562_s0 = inlined_call_operand.vmem [shape: s32[16], index: 0, kind: input, shape index: {}]   ;;  %s563_s3 = inlined_call_operand.vmem [shape: f32[64,1,32], index: 3, kind: input, shape index: {}]   ;;  %s564_s4 = inlined_call_operand.vmem [shape: f32[8,1,32], index: 4, kind: input, shape index: {}]   ;;  %s565_s5 = inlined_call_operand.hbm [shape: f32[16,1,32], index: 5, kind: output, shape index: {}]   ;;  %s566_s1 = inlined_call_operand.vmem [shape: s32[16], index: 1, kind: input, shape index: {}]   ;;  %s567_s2 = inlined_call_operand.vmem [shape: s32[16], index: 2, kind: input, shape index: {}]  }
   0x1   :  { %s10_s20 = sshll.u32 %s562_s0, 4  ;;  %s14_s23 = sshll.u32 %s566_s1, 4  ;;  %s11_s20 = int_to_ptr.vmem [resolvable:$true] %s10_s20  ;;  %s15_s23 = int_to_ptr.vmem [resolvable:$true] %s14_s23 }
   0x2   :  { %s313_s24 = scalar_lea.vmem %s11_s20, 16  ;;  %p318_p1 = scmp.lt.s32.totalorder %s11_s20, %s11_s20 }
   0x3   :  { %p314_p0 = scmp.ne.s32.totalorder %s11_s20, %s313_s24  ;;  %p319_p2 = scmp.lt.s32.totalorder %s313_s24, %s313_s24 }
   0x5   :  { %p320_p3 = por %p319_p2, %p318_p1 }
   0x7   :  { %p321_p4 = pnand %p320_p3, %p314_p0 }
   0x9   :  { %324 = shalt.err (!%p321_p4)  }
   0xa   :  { %s415_s25 = smov [#allocation3]   ;;  %s325_s26 = scalar_lea.vmem %s15_s23, 16 }
   0xb   :  { %13 = dma.vmem_to_smem %s11_s20, 16, %s415_s25, [#allocation2] }
   0xc   :  { %p326_p5 = scmp.ne.s32.totalorder %s15_s23, %s325_s26  ;;  %p330_p6 = scmp.lt.s32.totalorder %s15_s23, %s15_s23 }
   0xd   :  { %p331_p7 = scmp.lt.s32.totalorder %s325_s26, %s325_s26 }
   0xf   :  { %p332_p8 = por %p331_p7, %p330_p6 }
  0x11   :  { %p333_p9 = pnand %p332_p8, %p326_p5 }
  0x13   :  { %336 = shalt.err (!%p333_p9)  }
  0x14   :  { %s416_s0 = smov [#allocation4]   ;;  %s18_s28 = sshll.u32 %s567_s2, 4  ;;  %s19_s28 = int_to_ptr.vmem [resolvable:$true] %s18_s28 }
  0x15   :  { %17 = dma.vmem_to_smem %s15_s23, 16, %s416_s0, [#allocation2] }
  0x16   :  { %s337_s29 = scalar_lea.vmem %s19_s28, 16  ;;  %p342_p11 = scmp.lt.s32.totalorder %s19_s28, %s19_s28 }
  0x17   :  { %p338_p10 = scmp.ne.s32.totalorder %s19_s28, %s337_s29  ;;  %p343_p12 = scmp.lt.s32.totalorder %s337_s29, %s337_s29 }
  0x19   :  { %p344_p13 = por %p343_p12, %p342_p11 }
  0x1b   :  { %p345_p0 = pnand %p344_p13, %p338_p10 }
  0x1d   :  { %348 = shalt.err (!%p345_p0)  }
  0x1e   :  { %s417_s30 = smov [#allocation5]  }
  0x1f   :  { %21 = dma.vmem_to_smem %s19_s28, 16, %s417_s30, [#allocation2] }
  0x20   :  { %393 = dma.done.wait [#allocation2], 48 }
  0x21   :  { %394 = vsyncadd [#allocation2], 4294967248 }
  0x22   :  { %23 = sfence }
  0x23   :  { %24 = vsyncpa [#allocation7], 0 }
  0x24   :  { %26 = vsyncpa [#allocation7 + $0x1], 0  ;;  %s458_s6 = smov 0   ;;  %s460_s7 = smov 0  }
  0x25   :  { %s462_s2 = smov 0   ;;  %s464_s8 = smov 0  }
  0x26 LB: > { %s479_s9 = sadd.s32 4294967295, %s413_s8   ;;  %s264_s10 = sadd.s32 4294967294, %s413_s8   ;;  %s413_s8 = sphi %s464_s8, %s573_s8   ;;  %s409_s2 = sphi %s462_s2, %s572_s2   ;;  %s405_s7 = sphi %s460_s7, %s571_s7   ;;  %s401_s6 = sphi %s458_s6, %s570_s6  }
  0x27   : > { %s483_s11 = sadd.s32 1, %s413_s8   ;;  %s95_s12 = sadd.s32 1, %s409_s2 }
  0x28   : > { %s92_s13 = ssub.s32 %s413_s8, %s483_s11  ;;  %p105_p1 = scmp.ne.s32.totalorder %s409_s2, %s405_s7 }
  0x29   : > { %p93_p2 = scmp.eq.s32.totalorder %s92_s13, 0  ;;  %p106_p3 = scmp.eq.s32.totalorder %s479_s9, 15 }
  0x2a   : > { %p111_p4 = scmp.ne.s32.totalorder %s405_s7, %s401_s6  ;;  %p112_p5 = scmp.eq.s32.totalorder %s264_s10, 15 }
  0x2b   : > { %s494_s14 = scalar_select %p93_p2, %s409_s2, %s95_s12  }
  0x2c   : > { %p496_p6 = por %p106_p3, %p105_p1  ;;  %p500_p7 = por %p112_p5, %p111_p4 }
  0x2d   : > { %p267_p8 = scmp.ge.s32.totalorder %s413_s8, 1  ;;  %p146_p9 = scmp.lt.s32.totalorder %s413_s8, 17 }
  0x2f   : > { %p147_p10 = pnand %p267_p8, %p146_p9 }
  0x30   : > { %s170_s17 = sld [smem:[#allocation3 + %s479_s9]] (!%p147_p10)  ;;  %s168_s18 = sand.u32 (!%p147_p10), 1, %s405_s7   ;;  %vm188_vm0 = vcmask (!%p147_p10), 253952  }
  0x31   : > { %150 = sbr.rel (%p147_p10) target bundleno = 81 (0x51), region = 28  ;;  %s175_s19 = sld [smem:[#allocation4 + %s479_s9]] (!%p147_p10) }
  0x32   : > { %s180_s20 = sld [smem:[#allocation5 + %s479_s9]] (!%p147_p10)  ;;  %s169_s21 = scalar_lea.vmem (!%p147_p10), [#allocation6], %s168_s18 }
  0x33   : > { %s203_s22 = sshll.u32 (!%p147_p10), %s169_s21, 4  ;;  %s268_s27 = sshll.u32 (!%p147_p10), %s479_s9, 4  ;;  %s517_s22 = int_to_ptr.vmem [resolvable:$true] %s203_s22 }
  0x34   : > { %s522_s10 = scalar_lea.hbm (!%p147_p10), %s565_s5, %s268_s27  ;;  %s191_s12 = scalar_lea.sflag (!%p147_p10), [#allocation7], %s168_s18 }
  0x35   : > { %s349_s9 = scalar_lea.vmem (!%p147_p10), %s517_s22, 16  ;;  %s418_s13 = smov (!%p147_p10), [#allocation6]  }
  0x36   : > { %p171_p11 = scmp.lt.s32.totalorder (!%p147_p10), %s170_s17, 63  ;;  %p350_p0 = scmp.ne.s32.totalorder (!%p147_p10), %s517_s22, %s349_s9 }
  0x37   : > { %p176_p12 = scmp.lt.s32.totalorder (!%p147_p10), %s175_s19, 7 }
  0x38   : > { %s575_s17 = smov (!%p171_p11, %s170_s17), 63  ;;  %p181_p13 = scmp.ne.s32.totalorder %s180_s20, 0 }
  0x39   : > { %s577_s19 = smov (!%p176_p12, %s175_s19), 7  ;;  %s173_s25 = scalar_lea.vmem %s563_s3, %s575_s17 }
  0x3a   : > { %s178_s1 = scalar_lea.vmem %s564_s4, %s577_s19  ;;  %v183_v1 = vld [vmem:[%s173_s25] sm:$0x1]  ;;  %p351_p1 = pnand %p350_p0, %p496_p6 }
  0x3b   : > { %s184_s28 = scalar_select %p181_p13, 1, 0  ;;  %v182_v0 = vld [vmem:[%s178_s1] sm:$0x1] }
  0x3c   : > { %p352_p2 = pneg %p351_p1  ;;  %s353_s17 = sshll.u32 %s418_s13, 4  ;;  %s354_s17 = int_to_ptr.vmem [resolvable:$false] %s353_s17 }
  0x3d   : > { %v185_v2 = vstv %s184_s28  ;;  %s355_s19 = scalar_lea.vmem %s354_s17, 32  ;;  %p356_p3 = scmp.lt.s32.totalorder %s517_s22, %s354_s17 }
  0x3e   : > { %vm186_vm1 = vcmp.eq.s32.totalorder %v185_v2, 1  ;;  %p357_p4 = scmp.lt.s32.totalorder %s355_s19, %s349_s9 }
  0x3f   : > { %v187_v3 = vsel %vm186_vm1, %v182_v0, %v183_v1 }
  0x40   : > { %189 = vst.msk [vmem:[%s169_s21] sm:$0x1] %vm188_vm0, %v187_v3  ;;  %p358_p5 = por %p357_p4, %p356_p3 }
  0x42   : > { %p359_p8 = pnand %p358_p5, %p352_p2 }
  0x44   : > { %362 = shalt.err (!%p359_p8)
}
  0x45   : > { %s363_s18 = scalar_lea.hbm %s522_s10, 16  ;;  %s367_s23 = scalar_lea.hbm %s565_s5, 256 }
  0x46   : > { %p364_p9 = scmp.ne.s32.totalorder %s522_s10, %s363_s18  ;;  %p368_p12 = scmp.lt.u32.totalorder %s522_s10, %s565_s5 }
  0x47   : > { %p369_p13 = scmp.lt.u32.totalorder %s367_s23, %s363_s18  ;;  %p371_p1 = scmp.lt.u32.totalorder %s363_s18, %s522_s10 }
  0x48   : > { %p365_p10 = pnand %p364_p9, %p496_p6 }
  0x49   : > { %p370_p0 = por %p369_p13, %p368_p12 }
  0x4a   : > { %p366_p11 = pneg %p365_p10 }
  0x4b   : > { %p372_p2 = por %p371_p1, %p370_p0 }
  0x4d   : > { %p373_p3 = pnand %p372_p2, %p366_p11 }
  0x4f   : > { %376 = shalt.err (!%p373_p3)
}
  0x50   : > { %271 = dma.vmem_to_hbm [thread:$0]  (%p496_p6), %s517_s22, 16, %s522_s10, %s191_s12  }
  0x51 PF: > { %p277_p4 = scmp.ge.s32.totalorder %s413_s8, 2  ;;  %s215_s26 = sand.u32 1, %s401_s6  }
  0x52   : > { %s216_s0 = scalar_lea.sflag [#allocation7], %s215_s26 }
  0x53   : > { %p274_p5 = pnand %p277_p4, %p500_p7 }
  0x55   : > { %396 = dma.done.wait (!%p274_p5), %s216_s0, 16  }
  0x56   : > { %398 = vsyncadd (!%p274_p5), %s216_s0, 4294967280  ;;  %p29_p8 = scmp.ge.s32.totalorder %s483_s11, 18   ;;  %s570_s6 = smov %s405_s7 }
  0x57   : > { %s571_s7 = smov %s409_s2  ;;  %s572_s2 = smov %s494_s14 }
  0x58   : > { %s573_s8 = smov %s483_s11  ;;  %31 = sbr.rel (!%p29_p8) target bundleno = 38 (0x26), region = 66 }
  0x5f   :  { %220 = vsyncpa [#allocation7], 1 }
  0x60   :  { %222 = vsyncpa [#allocation7 + $0x1], 1 }

// kernel: graph_encoder_forward.2
= control target key start
LH: loop header
LB: loop body
LE: loop exit
PB: predicated region body
PF: predicated region fallthrough
CT: control target
= control target key end

     0   :  { %s1870_s0 = inlined_call_operand.vmem [shape: s32[8], index: 0, kind: input, shape index: {}]   ;;  %s1871_s2 = inlined_call_operand.vmem [shape: f32[4,16], index: 2, kind: input, shape index: {}]   ;;  %s1872_s3 = inlined_call_operand.vmem [shape: bf16[16,32], index: 3, kind: input, shape index: {}]   ;;  %s1873_s4 = inlined_call_operand.hbm [shape: f32[1,32], index: 4, kind: input, shape index: {}]   ;;  %s1874_s5 = inlined_call_operand.vmem [shape: f32[1,32], index: 5, kind: input, shape index: {}]   ;;  %s1875_s6 = inlined_call_operand.vmem [shape: f32[32,8], index: 6, kind: input, shape index: {}]   ;;  %s1876_s7 = inlined_call_operand.vmem [shape: f32[8,32], index: 7, kind: input, shape index: {}]   ;;  %s1877_s8 = inlined_call_operand.vmem [shape: bf16[2,32,32], index: 8, kind: input, shape index: {}]   ;;  %s1878_s9 = inlined_call_operand.vmem [shape: bf16[2,32,32], index: 9, kind: input, shape index: {}]   ;;  %s1879_s10 = inlined_call_operand.vmem [shape: bf16[2,32,32], index: 10, kind: input, shape index: {}]   ;;  %s1880_s11 = inlined_call_operand.vmem [shape: f32[2,1,32], index: 11, kind: input, shape index: {}]   ;;  %s1881_s12 = inlined_call_operand.vmem [shape: f32[2,1,32], index: 12, kind: input, shape index: {}]   ;;  %s1882_s13 = inlined_call_operand.vmem [shape: bf16[32,32], index: 13, kind: input, shape index: {}]   ;;  %s1883_s14 = inlined_call_operand.vmem [shape: f32[1,32], index: 14, kind: input, shape index: {}]   ;;  %s1884_s15 = inlined_call_operand.vmem [shape: bf16[32,64], index: 15, kind: input, shape index: {}]   ;;  %s1885_s16 = inlined_call_operand.vmem [shape: f32[1,64], index: 16, kind: input, shape index: {}]   ;;  %s1886_s17 = inlined_call_operand.vmem [shape: f32[4,64], index: 17, kind: output, shape index: {}]   ;;  %s1887_s1 = inlined_call_operand.vmem [shape: s32[8], index: 1, kind: input, shape index: {}]  }
   0x1   :  { %1890 = sst [smem:[#allocation16_spill]] %s1870_s0  ;;  %s26_s29 = sshll.u32 %s1887_s1, 4  ;;  %s27_s29 = int_to_ptr.vmem [resolvable:$true] %s26_s29 }
   0x2   :  { %1891 = sst [smem:[#allocation17_spill]] %s1871_s2  ;;  %s1894_s26 = sld [smem:[#allocation16_spill]] }
   0x3   :  { %1892 = sst [smem:[#allocation18_spill]] %s1873_s4 }
   0x4   :  { %1893 = sst [smem:[#allocation19_spill]] %s1876_s7 }
   0x8   :  { %s22_s7 = sshll.u32 %s1894_s26, 4  ;;  %s23_s7 = int_to_ptr.vmem [resolvable:$true] %s22_s7 }
   0x9   :  { %s1505_s0 = scalar_lea.vmem %s23_s7, 16  ;;  %p1510_p1 = scmp.lt.s32.totalorder %s23_s7, %s23_s7 }
   0xa   :  { %p1506_p0 = scmp.ne.s32.totalorder %s23_s7, %s1505_s0  ;;  %p1511_p2 = scmp.lt.s32.totalorder %s1505_s0, %s1505_s0 }
   0xc   :  { %p1512_p3 = por %p1511_p2, %p1510_p1 }
   0xe   :  { %p1513_p4 = pnand %p1512_p3, %p1506_p0 }
  0x10   :  { %1516 = shalt.err (!%p1513_p4)  }
  0x11   :  { %s1587_s30 = smov [#allocation10]   ;;  %s1517_s18 = scalar_lea.vmem %s27_s29, 16 }
  0x12   :  { %25 = dma.vmem_to_smem %s23_s7, 16, %s1587_s30, [#allocation9] }
  0x13   :  { %p1518_p5 = scmp.ne.s32.totalorder %s27_s29, %s1517_s18  ;;  %p1522_p6 = scmp.lt.s32.totalorder %s27_s29, %s27_s29 }
  0x14   :  { %p1523_p7 = scmp.lt.s32.totalorder %s1517_s18, %s1517_s18 }
  0x16   :  { %p1524_p8 = por %p1523_p7, %p1522_p6 }
  0x18   :  { %p1525_p9 = pnand %p1524_p8, %p1518_p5 }
  0x1a   :  { %1528 = shalt.err (!%p1525_p9)  }
  0x1b   :  { %s1588_s19 = smov [#allocation11]  }
  0x1c   :  { %29 = dma.vmem_to_smem %s27_s29, 16, %s1588_s19, [#allocation9] }
  0x1d   :  { %1569 = dma.done.wait [#allocation9], 32 }
  0x1e   :  { %1570 = vsyncadd [#allocation9], 4294967264 }
  0x1f   :  { %31 = sfence }
  0x20   :  { %32 = vsyncpa [#allocation13], 0  ;;  %s1693_s1 = smov 0  }
  0x21 LB: > { %s1699_s7 = sadd.s32 4294967295, %s1577_s1   ;;  %p1308_p10 = scmp.ge.s32.totalorder %s1577_s1, 1  ;;  %s1577_s1 = sphi %s1693_s1, %s38_s1  }
  0x22   : > { %p404_p11 = scmp.lt.s32.totalorder %s1577_s1, 3  ;;  %p1888_p0 = scmp.eq.s32.totalorder %s1699_s7, 0 }
  0x23   : > { %s1589_s20 = smov [#allocation12]   ;;  %s1897_s4 = sld [smem:[#allocation18_spill]] }
  0x24   : > { %p1704_p13 = pnand %p1308_p10, %p404_p11  ;;  %s423_s21 = sshll.u32 %s1589_s20, 4  ;;  %s424_s21 = int_to_ptr.vmem [resolvable:$true] %s423_s21 }
  0x26   : > { %s1895_s2 = scalar_select %p1704_p13, 1, 0 }
  0x27   : > { %p1448_p1 = pneg %p1704_p13 }
  0x29   : > { %p1713_p2 = pnand %p1888_p0, %p1448_p1  ;;  %s1529_s25 = scalar_lea.hbm %s1897_s4, 16 }
  0x2a   : > { %p1530_p3 = scmp.ne.s32.totalorder %s1897_s4, %s1529_s25  ;;  %p1536_p7 = scmp.lt.u32.totalorder %s1529_s25, %s1897_s4 }
  0x2b   : > { %p1531_p4 = pneg %p1713_p2 }
  0x2d   : > { %p1532_p5 = pnand %p1531_p4, %p1530_p3 }
  0x2f   : > { %p1533_p6 = pneg %p1532_p5 }
  0x31   : > { %p1538_p8 = pnand %p1536_p7, %p1533_p6 }
  0x33   : > { %1541 = shalt.err (!%p1538_p8)
}
  0x34   : > { %s1542_s0 = scalar_lea.vmem %s424_s21, 16  ;;  %s1549_s30 = scalar_lea.vmem %s424_s21, 32 }
  0x35   : > { %p1543_p9 = scmp.ne.s32.totalorder %s424_s21, %s1542_s0  ;;  %p1550_p1 = scmp.lt.s32.totalorder %s424_s21, %s424_s21 }
  0x36   : > { %p1551_p12 = scmp.lt.s32.totalorder %s1549_s30, %s1542_s0 }
  0x37   : > { %p1545_p10 = pnand %p1543_p9, %p1531_p4 }
  0x38   : > { %p1552_p0 = por %p1551_p12, %p1550_p1 }
  0x39   : > { %p1546_p11 = pneg %p1545_p10 }
  0x3b   : > { %p1553_p13 = pnand %p1552_p0, %p1546_p11 }
  0x3d   : > { %1556 = shalt.err (!%p1553_p13)
}
  0x3e   : > { %1451 = dma.hbm_to_vmem [thread:$0]  (!%p1713_p2), %s1897_s4, 16, %s424_s21, [#allocation13]  }
  0x3f   : > { %p1898_p3 = scmp.ne.s32.totalorder %s1895_s2, 0 }
  0x40   : > { %p1899_p5 = scmp.eq.s32.totalorder (!%p1898_p3), %s1699_s7, 0 }
  0x41   : > { %493 = sbr.rel (%p1898_p3) target bundleno = 1767 (0x6e7), region = 80 }
  0x48   : > { %1572 = dma.done.wait (%p1899_p5), [#allocation13], 16   ;;  %p1900_p4 = pmov %p1899_p5 }
  0x49   : > { %p552_p12 = scmp.lt.s32.totalorder %s1699_s7, 1  ;;  %p1901_p13 = scmp.ne.s32.totalorder %s1699_s7, 0 }
  0x4a   : > { %1574 = vsyncadd (%p1900_p4), [#allocation13], 4294967280  ;;  %v1488_v0 = vld [vmem:[%s1872_s3] sm:$0xff] (!%p1901_p13)   ;;  %v1590_v1 = vmov (!%p1901_p13), 0.0   ;;  %s1902_s28 = sld [smem:[#allocation17_spill]] (!%p1901_p13)  ;;  %vm1591_vm0 = vmmov (!%p1901_p13), 0  }
  0x4b   : > { %s1741_s20 = scalar_select %p552_p12, %s1699_s7, 1 }
  0x4c   : > { %577 = sbr.rel (%p1901_p13) target bundleno = 300 (0x12c), region = 88  ;;  %1376 = vmatprep.subr.bf16.mxu0 (!%p1901_p13), %v1590_v1  ;;  %1378 = vmatprep.mubr.msk.bf16.mxu0 (!%p1901_p13), %vm1591_vm0, %v1590_v1  ;;  %vm595_vm1 = vcmask (!%p1901_p13), 130048   ;;  %v1320_v4 = vld [vmem:[#allocation12] ss:$0 sm:$0xff] (!%p1901_p13)  ;;  %v1323_v6 = vld [vmem:[%s1874_s5] ss:$0 sm:$0xff] (!%p1901_p13) }
  0x4d   : > { %s1349_s22 = sshll.u32 %s1741_s20, 4  ;;  %s569_s2 = scalar_lea.vmem %s1880_s11, %s1741_s20  ;;  %1377 = vmatpush3.bf16.msra.mxu0 (!%p1901_p13), %v1488_v0  ;;  %vm647_vm2 = vcmask (!%p1901_p13), 257024  }
  0x4e   : > { %s1751_s26 = scalar_lea.vmem %s1877_s8, %s1349_s22  ;;  %s1756_s29 = scalar_lea.vmem %s1878_s9, %s1349_s22 }
  0x4f   : > { %s1761_s18 = scalar_lea.vmem %s1879_s10, %s1349_s22  ;;  %s572_s23 = scalar_lea.vmem %s1881_s12, %s1741_s20 }
  0x50   : > { %v578_v2 = vld [vmem:[%s1902_s28] sm:$0xf] (!%p1901_p13) }
  0x51   : > { %v579_v3 = vpack.c.bf16 (!%p1901_p13), %v578_v2, %v578_v2 }
  0x53   : > { %1379 = vmatmul.mubr.msk.bf16.vlgmr.msra.gmra.mrb[0].mxu0 %vm595_vm1, %v579_v3 }
 0x126   : > { %v633_v5 = vpop.f32.mrb[0].mxu0 }
 0x127   : > { %v634_v7 = vadd.f32 %v1320_v4, %v633_v5  ;;  %v1380_v8 = vpop.f32.mrb[1].mxu0 }
 0x128   : > { %v636_v9 = vpop.f32.mrb[2].mxu0 }
 0x129   : > { %v646_v10 = vadd.f32 %v1323_v6, %v634_v7  ;;  %v1381_v11 = vpop.f32.mrb[3].mxu0 }
 0x12b   : > { %648 = vst.msk [vmem:[#allocation2] sm:$0xf] %vm647_vm2, %v646_v10 }
 0x12c PF: > { %vm649_vm3 = vcmask 257024   ;;  %v1592_v12 = vmov 0.0   ;;  %s1579_s0 = smov 0  }
 0x12d   : > { %650 = vst.msk [vmem:[#allocation3] sm:$0xf] %vm649_vm3, %v1592_v12  ;;  %651 = vst.msk [vmem:[#allocation4] sm:$0xf] %vm649_vm3, %v1592_v12 }
 0x12e LB: >> { %s658_s30 = sld [smem:[#allocation10 + %s1581_s0]]  ;;  %vm663_vm4 = vcmask 253952   ;;  %s662_s24 = scalar_lea.vmem [#allocation5], %s1581_s0  ;;  %s1581_s0 = sphi %s1579_s0, %s657_s0  }
 0x12f   : >> { %s659_s19 = sld [smem:[#allocation11 + %s1581_s0]]  ;;  %s667_s27 = scalar_lea.vmem [#allocation6], %s1581_s0 }
 0x130   : >> { %s657_s0 = sadd.s32 1, %s1581_s0  }
 0x131   : >> { %p654_p0 = scmp.ge.s32.totalorder %s657_s0, 8  }
 0x132   : > { %1382 = vmatprep.subr.bf16.mxu0 (%p654_p0), %v1592_v12  ;;  %1390 = vmatprep.subr.bf16.mxu1 (%p654_p0), %v1592_v12  ;;  %v1489_v15 = vld [vmem:[%s1751_s26] sm:$0xff] (%p654_p0)   ;;  %vm1593_vm5 = vmmov (%p654_p0), 0   ;;  %v1491_v17 = vld [vmem:[%s1751_s26 + $0x8] sm:$0xff] (%p654_p0)   ;;  %vm689_vm6 = vcmask (%p654_p0), 261120   ;;  %v1594_v26 = vmov (%p654_p0), 0.0|0.0   ;;  %v851_v27 = vld [vmem:[%s1875_s6 + $0x10] sm:$0xff] (%p654_p0) }
 0x133   : > { %656 = sbr.rel (!%p654_p0) target bundleno = 302 (0x12e), region = 153  ;;  %v1490_v16 = vld [vmem:[%s1756_s29] sm:$0xff] (%p654_p0)   ;;  %1386 = vmatprep.mubr.msk.bf16.mxu0 (%p654_p0), %vm1593_vm5, %v1592_v12  ;;  %1394 = vmatprep.mubr.msk.bf16.mxu1 (%p654_p0), %vm1593_vm5, %v1592_v12  ;;  %v1492_v18 = vld [vmem:[%s1756_s29 + $0x8] sm:$0xff] (%p654_p0)   ;;  %v852_v28 = vld [vmem:[%s1875_s6 + $0x18] sm:$0xff] (%p654_p0)  ;;  %vm931_vm7 = vcmask (%p654_p0), 64512  }
 0x134   : >> { %s660_s21 = scalar_lea.vmem [#allocation2], %s658_s30  ;;  %1383 = vmatpush3.bf16.msra.mxu0 (%p654_p0), %v1489_v15  ;;  %1391 = vmatpush3.bf16.msra.mxu1 (%p654_p0), %v1490_v16  ;;  %v849_v21 = vld [vmem:[%s1875_s6] sm:$0xff] (%p654_p0)  ;;  %v850_v23 = vld [vmem:[%s1875_s6 + $0x8] sm:$0xff] (%p654_p0)  ;;  %v1442_v29 = vpack.c.bf16 (%p654_p0), %v852_v28, %v851_v27 }
 0x135   : >> { %v661_v13 = vld [vmem:[%s660_s21] sm:$0x1]  ;;  %s665_s25 = scalar_lea.vmem [#allocation2], %s659_s19  ;;  %1384 = vmatprep.subr.bf16.mxu0 (%p654_p0), %v1592_v12  ;;  %1392 = vmatprep.subr.bf16.mxu1 (%p654_p0), %v1592_v12  ;;  %v1439_v25 = vpack.c.bf16 (%p654_p0), %v850_v23, %v849_v21  ;;  %v1494_v41 = vld [vmem:[%s1761_s18 + $0x8] sm:$0xff] (%p654_p0)  }
 0x136   : >> { %664 = vst.msk [vmem:[%s662_s24] sm:$0x1] %vm663_vm4, %v661_v13  ;;  %v666_v14 = vld [vmem:[%s665_s25] sm:$0x1]  ;;  %s1903_s25 = sld [smem:[#allocation19_spill]] (%p654_p0) }
 0x137   : >> { %668 = vst.msk [vmem:[%s667_s27] sm:$0x1] %vm663_vm4, %v666_v14  ;;  %v1493_v39 = vld [vmem:[%s1761_s18] sm:$0xff] (%p654_p0)   ;;  %s1583_s18 = smov (%p654_p0), 0  }
 0x138   : > { %1385 = vmatpush3.bf16.msra.mxu0 (%p654_p0), %v1491_v17  ;;  %1393 = vmatpush3.bf16.msra.mxu1 (%p654_p0), %v1492_v18 }
 0x139   : > { %1398 = vmatprep.subr.bf16.mxu0 (%p654_p0), %v1592_v12  ;;  %1438 = vmatprep.subr.bf16.mxu1 (%p654_p0), %v1594_v26 }
 0x13c   : > { %v930_v40 = vld [vmem:[%s1903_s25] sm:$0xff] }
 0x13d   : > { %v669_v19 = vld [vmem:[#allocation5] sm:$0xff] }
 0x13e   : > { %v671_v20 = vld [vmem:[#allocation6] sm:$0xff]  ;;  %v670_v22 = vpack.c.bf16 %v669_v19, %v669_v19 }
 0x13f   : > { %v672_v24 = vpack.c.bf16 %v671_v20, %v671_v20 }
 0x140   : > { %1387 = vmatmul.mubr.msk.bf16.vlgmr.msra.gmra.mrb[0].mxu0 %vm689_vm6, %v670_v22 }
 0x141   : > { %1395 = vmatmul.mubr.msk.bf16.vlgmr.msra.gmra.mrb[0].mxu1 %vm689_vm6, %v672_v24  ;;  %1402 = vmatprep.mubr.msk.bf16.mxu0 %vm1593_vm5, %v1592_v12 }
 0x142   : > { %1440 = vmatpush3.bf16.msra.mxu1 %v1439_v25  ;;  %1414 = vmatprep.mubr.msk.f32.mxu1 %vm1593_vm5, %v1592_v12 }
 0x143   : > { %1441 = vmatprep.subr.bf16.mxu1 %v1594_v26  ;;  %1399 = vmatpush3.bf16.msra.mxu0 %v1493_v39 }
 0x144   : > { %1400 = vmatprep.subr.bf16.mxu0 %v1592_v12 }
 0x146   : > { %1443 = vmatpush3.bf16.msra.mxu1 %v1442_v29 }
 0x147   : > { %1417 = vmatprep.subr.mxu1 %v1592_v12  ;;  %1401 = vmatpush3.bf16.msra.mxu0 %v1494_v41 }
 0x14a   : > { %1403 = vmatmul.mubr.msk.bf16.vlgmr.msra.gmra.mrb[4].mxu0 %vm689_vm6, %v672_v24 }
 0x213   : > { %v727_v30 = vpop.f32.mrb[0].mxu0 }
 0x214   : > { %v786_v31 = vpop.f32.mrb[0].mxu1  ;;  %v1388_v32 = vpop.f32.mrb[1].mxu0 }
 0x215   : > { %v848_v33 = vmul.f32 %v786_v31, %v727_v30  ;;  %v1396_v34 = vpop.f32.mrb[1].mxu1  ;;  %v730_v35 = vpop.f32.mrb[2].mxu0 }
 0x216   : > { %v789_v36 = vpop.f32.mrb[2].mxu1  ;;  %v1389_v37 = vpop.f32.mrb[3].mxu0 }
 0x217   : > { %v1397_v38 = vpop.f32.mrb[3].mxu1  ;;  %1415 = vmatmul.mubr.msk.f32.vlgmr.msra.gmra.mrb[4].mxu1 %vm689_vm6, %v848_v33 }
 0x218   : > { %1419 = vmatprep.mubr.msk.f32.mxu1 %vm1593_vm5, %v1592_v12  ;;  %1418 = vmatpush3.msra.mxu1 %v930_v40 }
 0x21d   : > { %v842_v47 = vpop.f32.mrb[4].mxu0 }
 0x21e   : > { %v1404_v48 = vpop.f32.mrb[5].mxu0 }
 0x21f   : > { %v845_v49 = vpop.f32.mrb[6].mxu0 }
 0x220   : > { %v1405_v50 = vpop.f32.mrb[7].mxu0 }
 0x2ea   : > { %v922_v42 = vpop.f32.mrb[4].mxu1 }
 0x2eb   : > { %v1334_v43 = vclamps-f32 %v922_v42, 10.0  ;;  %v1416_v44 = vpop.f32.mrb[5].mxu1 }
 0x2ed   : > { %v928_v45 = vmul.f32 1.442695, %v1334_v43 }
 0x2ef   : > { %1495 = vpow2.f32 %v928_v45 }
 0x2f9   : > { %v1496_v46 = vpop.eup %1495 }
 0x2fa   : > { %1420 = vmatmul.mubr.msk.f32.vlgmr.msra.gmra.mrb[6].mxu1 %vm931_vm7, %v1496_v46 }
 0x3cd   : > { %v1001_v51 = vpop.f32.mrb[6].mxu1 }
 0x3ce   : > { %v1005_v52 = vmul.f32 %v1001_v51, %v842_v47  ;;  %1007 = vst.msk [vmem:[#allocation8] sm:$0xff] %vm689_vm6, %v1001_v51  ;;  %v1421_v53 = vpop.f32.mrb[7].mxu1 }
 0x3d0   : > { %1006 = vst.msk [vmem:[#allocation7] sm:$0xff] %vm689_vm6, %v1005_v52 }
 0x3d1 LB: >> { %s1014_s27 = sld [smem:[#allocation10 + %s1585_s18]]  ;;  %s1017_s28 = scalar_lea.vmem [#allocation7], %s1585_s18  ;;  %s1585_s18 = sphi %s1583_s18, %s1013_s18  }
 0x3d2   : >> { %s1024_s4 = scalar_lea.vmem [#allocation8], %s1585_s18  ;;  %s1013_s18 = sadd.s32 1, %s1585_s18  }
 0x3d3   : >> { %p1010_p2 = scmp.ge.s32.totalorder %s1013_s18, 8  }
 0x3d4   : > { %v1033_v0 = vld [vmem:[#allocation2] sm:$0xf] (%p1010_p2)  ;;  %p1338_p6 = scmp.ne.s32.totalorder (%p1010_p2), %s1699_s7, 1 }
 0x3d5   : >> { %v1025_v55 = vld [vmem:[%s1024_s4] sm:$0x1] }
 0x3d6   : > { %1012 = sbr.rel (!%p1010_p2) target bundleno = 977 (0x3d1), region = 164  ;;  %v1336_v13 = vld [vmem:[%s569_s2] ss:$0 sm:$0xff] (%p1010_p2) }
 0x3d7   : >> { %v1018_v54 = vld [vmem:[%s1017_s28] sm:$0x1]  ;;  %s1015_s22 = scalar_lea.vmem [#allocation3], %s1014_s27  ;;  %s1022_s0 = scalar_lea.vmem [#allocation4], %s1014_s27 }
 0x3d8   : >> { %v1016_v56 = vld [vmem:[%s1015_s22] sm:$0x1] }
 0x3d9   : >> { %v1023_v57 = vld [vmem:[%s1022_s0] sm:$0x1]  ;;  %v1019_v58 = vadd.f32 %v1018_v54, %v1016_v56 }
 0x3da   : >> { %v1026_v59 = vadd.f32 %v1025_v55, %v1023_v57  ;;  %v1337_v15 = vld [vmem:[%s572_s23] ss:$0 sm:$0xff] (%p1010_p2) }
 0x3db   : >> { %1021 = vst.msk [vmem:[%s1015_s22] sm:$0x1] %vm663_vm4, %v1019_v58 }
 0x3dc   : >> { %1027 = vst.msk [vmem:[%s1022_s0] sm:$0x1] %vm663_vm4, %v1026_v59 }
 0x3dd   : > { %v1501_v18 = vld [vmem:[%s1882_s13] sm:$0xff] (!%p1338_p6)   ;;  %v1595_v19 = vmov (!%p1338_p6), 0.0   ;;  %v1502_v20 = vld [vmem:[%s1882_s13 + $0x8] sm:$0xff] (!%p1338_p6)   ;;  %vm1596_vm8 = vmmov (!%p1338_p6), 0   ;;  %vm1205_vm9 = vcmask (!%p1338_p6), 519168  }
 0x3de   : > { %1422 = vmatprep.subr.bf16.mxu0 (!%p1338_p6), %v1595_v19  ;;  %1430 = vmatprep.subr.bf16.mxu1 (!%p1338_p6), %v1595_v19  ;;  %v1503_v22 = vld [vmem:[%s1884_s15] sm:$0xff] (!%p1338_p6)   ;;  %v1504_v24 = vld [vmem:[%s1884_s15 + $0x8] sm:$0xff] (!%p1338_p6)  }
 0x3df   : > { %1423 = vmatpush3.bf16.msra.mxu0 (!%p1338_p6), %v1501_v18  ;;  %1426 = vmatprep.mubr.msk.bf16.mxu0 (!%p1338_p6), %vm1596_vm8, %v1595_v19  ;;  %v1339_v25 = vld [vmem:[%s1883_s14] ss:$0 sm:$0xff] (!%p1338_p6) }
 0x3e0   : > { %1424 = vmatprep.subr.bf16.mxu0 (!%p1338_p6), %v1595_v19  ;;  %1434 = vmatprep.mubr.msk.bf16.mxu1 (!%p1338_p6), %vm1596_vm8, %v1595_v19  ;;  %v1343_v32 = vld [vmem:[%s1885_s16] ss:$0 sm:$0xff] (!%p1338_p6) }
 0x3e1   : > { %1431 = vmatpush3.bf16.msra.mxu1 (!%p1338_p6), %v1503_v22 }
 0x3e2   : > { %v1028_v62 = vld [vmem:[#allocation3] sm:$0xf]  ;;  %1432 = vmatprep.subr.bf16.mxu1 (!%p1338_p6), %v1595_v19 }
 0x3e3   : > { %v1029_v60 = vld [vmem:[#allocation4] sm:$0xf]  ;;  %1425 = vmatpush3.bf16.msra.mxu0 (!%p1338_p6), %v1502_v20 }
 0x3e4   : > { %v1030_v61 = vadd.f32 1e-08, %v1029_v60 }
 0x3e5   : > { %1433 = vmatpush3.bf16.msra.mxu1 (!%p1338_p6), %v1504_v24 }
 0x3e6   : > { %1497 = vrcp.f32 %v1030_v61 }
 0x3f0   : > { %v1498_v63 = vpop.eup %1497 }
 0x3f1   : > { %v1032_v1 = vmul.f32 %v1498_v63, %v1028_v62 }
 0x3f3   : > { %v1034_v2 = vadd.f32 %v1033_v0, %v1032_v1 }
 0x3f5   : > { %v1035_v3 = vsel %vm649_vm3, %v1034_v2, 0.0 }
 0x3f6   : > { %1036 = vadd.xlane.f32.xlu0 %v1035_v3 }
 0x483   : > { %v1037_v4 = vpop.xlane.xlu0 %1036 }
 0x484   : > { %v1039_v5 = vmul.f32 0.03125, %v1037_v4 }
 0x486   : > { %v1040_v6 = vsub.f32 %v1034_v2, %v1039_v5 }
 0x488   : > { %v1041_v7 = vmul.f32 %v1040_v6, %v1040_v6 }
 0x48a   : > { %v1042_v8 = vsel %vm649_vm3, %v1041_v7, 0.0 }
 0x48b   : > { %1043 = vadd.xlane.f32.xlu0 %v1042_v8 }
 0x518   : > { %v1044_v9 = vpop.xlane.xlu0 %1043 }
 0x519   : > { %v1045_v10 = vmul.f32 0.03125, %v1044_v9 }
 0x51b   : > { %v1046_v11 = vadd.f32 1e-06, %v1045_v10 }
 0x51d   : > { %1499 = vrsqrt.f32 %v1046_v11 }
 0x527   : > { %v1500_v12 = vpop.eup %1499 }
 0x528   : > { %v1048_v14 = vmul.f32 %v1500_v12, %v1040_v6  ;;  %1069 = sbr.rel (%p1338_p6) target bundleno = 1767 (0x6e7), region = 106 }
 0x52a   : > { %v1056_v16 = vmul.f32 %v1336_v13, %v1048_v14 }
 0x52c   : > { %v1064_v17 = vadd.f32 %v1337_v15, %v1056_v16 }
 0x52e   : > { %1065 = vst.msk [vmem:[#allocation2] sm:$0xf] %vm649_vm3, %v1064_v17 }
 0x535   : > { %v1070_v21 = vld [vmem:[#allocation2] sm:$0xf] }
 0x536   : > { %v1071_v23 = vpack.c.bf16 %v1070_v21, %v1070_v21 }
 0x538   : > { %1427 = vmatmul.mubr.msk.bf16.vlgmr.msra.gmra.mrb[0].mxu0 %vm689_vm6, %v1071_v23 }
 0x60b   : > { %v1132_v26 = vpop.f32.mrb[0].mxu0 }
 0x60c   : > { %v1133_v27 = vadd.f32 %v1339_v25, %v1132_v26  ;;  %v1428_v28 = vpop.f32.mrb[1].mxu0 }
 0x60d   : > { %v1135_v29 = vpop.f32.mrb[2].mxu0 }
 0x60e   : > { %v1138_v30 = vpack.c.bf16 %v1133_v27, %v1133_v27  ;;  %v1429_v31 = vpop.f32.mrb[3].mxu0 }
 0x610   : > { %1435 = vmatmul.mubr.msk.bf16.vlgmr.msra.gmra.mrb[0].mxu1 %vm689_vm6, %v1138_v30 }
 0x6e3   : > { %v1199_v33 = vpop.f32.mrb[0].mxu1 }
 0x6e4   : > { %v1200_v34 = vadd.f32 %v1343_v32, %v1199_v33  ;;  %v1436_v35 = vpop.f32.mrb[1].mxu1 }
 0x6e5   : > { %v1202_v36 = vpop.f32.mrb[2].mxu1 }
 0x6e6   : > { %1206 = vst.msk [vmem:[%s1886_s17] sm:$0xf] %vm1205_vm9, %v1200_v34  ;;  %v1437_v37 = vpop.f32.mrb[3].mxu1 }
 0x6e7 PF: > { %s38_s1 = sadd.s32 1, %s1577_s1  }
 0x6e8   : > { %p35_p7 = scmp.ge.s32.totalorder %s38_s1, 4  }
 0x6ea   :  { %37 = sbr.rel (!%p35_p7) target bundleno = 33 (0x21), region = 175 }
 0x6f1   :  { %1218 = vsyncpa [#allocation13], 1 }
 0x6f2   :  { %1220 = vsyncpa [#allocation13 + $0x1], 1 }

</bundles_post_ra>
